<compile_context>
chip_gen: v6e
topology: v6e:2x2x1
jax: 0.10.0
libtpu: 0.0.40
codegen_flags: <defaults>
</compile_context>

<pallas_src>
import math

import jax
import jax.numpy as jnp
from jax.experimental import pallas as pl
from jax.experimental.pallas import tpu as pltpu


# ---------------------------------------------------------------------------
# Fused kernel: dot-product causal intervention -> projection -> classifier
# ---------------------------------------------------------------------------
def _ccim_fused_kernel(jf_ref, conf_ref, prior_ref,
                       wq_ref, wk_ref, wh_ref, wg_ref,
                       w1_ref, b1_ref, w2_ref, b2_ref,
                       out_ref):
    jf = jf_ref[...]          # [B, F]
    conf = conf_ref[...]      # [N, G]
    prior = prior_ref[...]    # [1, N]

    # --- dot_product_intervention -----------------------------------------
    query = jnp.dot(jf, wq_ref[...], preferred_element_type=jnp.float32)    # [B, 256]
    key = jnp.dot(conf, wk_ref[...], preferred_element_type=jnp.float32)    # [N, 256]

    # mid = query @ key.T / sqrt(con_size)   (con_size == num_gz == G)
    mid = jax.lax.dot_general(
        query, key,
        dimension_numbers=(((1,), (1,)), ((), ())),
        preferred_element_type=jnp.float32)                                 # [B, N]
    mid = mid * jnp.float32(1.0 / math.sqrt(conf.shape[1]))

    # softmax over the confounder axis (dim=-1); reciprocal on the EUP slot
    mid = mid - jnp.max(mid, axis=-1, keepdims=True)
    e = jnp.exp(mid)
    attn = e * pl.reciprocal(jnp.sum(e, axis=-1, keepdims=True), approx=True)  # [B, N]

    # (attn[:,:,None] * conf[None] * prior[None]).sum(1) == (attn * prior_row) @ conf
    g_z = jnp.dot(attn * prior, conf, preferred_element_type=jnp.float32)    # [B, G]

    # --- CCIM projection ----------------------------------------------------
    do_x = (jnp.dot(jf, wh_ref[...], preferred_element_type=jnp.float32)
            + jnp.dot(g_z, wg_ref[...], preferred_element_type=jnp.float32))  # [B, 128]

    # --- classifier (BN pre-folded into fc1; dropout = identity) ------------
    h = jnp.dot(do_x, w1_ref[...], preferred_element_type=jnp.float32) + b1_ref[...]
    c = jnp.float32(math.sqrt(2.0 / math.pi))
    h = 0.5 * h * (1.0 + jnp.tanh(c * (h + 0.044715 * h * h * h)))           # tanh-gelu
    y = jnp.dot(h, w2_ref[...], preferred_element_type=jnp.float32) + b2_ref[...]

    # residual + 0.3 * out
    out_ref[...] = do_x + 0.3 * y


def _vmem_specs(n):
    return [pl.BlockSpec(memory_space=pltpu.MemorySpace.VMEM) for _ in range(n)]


def _cost_estimate(B, F, G, N):
    flops = 2 * (B * F * 256        # query
                 + N * G * 256      # key
                 + B * N * 256      # query @ key.T
                 + B * N * G        # weighted @ conf
                 + B * F * 128      # proj_h
                 + B * G * 128      # proj_g
                 + B * 128 * 512    # fc1
                 + B * 512 * 128)   # fc2
    transcendentals = 2 * B * N + B * 512          # exp + recip (softmax), tanh (gelu)
    bytes_accessed = 4 * (B * F + N * G + N
                          + F * 256 + G * 256 + F * 128 + G * 128
                          + 128 * 512 + 512 + 512 * 128 + 128
                          + B * 128)
    return pl.CostEstimate(flops=flops, transcendentals=transcendentals,
                           bytes_accessed=bytes_accessed)


@jax.jit
def ccim_forward(joint_feature, confounder, prior, params):
    """CCIM forward (dp_cause strategy, inference). Returns `out` [B, 128].

    NOTE: the original module also computes the dataset head (emotic_fc) but
    discards it and returns `out`; the dead matmul is dropped here (DCE).
    """
    B, F = joint_feature.shape
    N, G = confounder.shape
    prior_row = prior.reshape(1, -1)  # [1, N]

    out = pl.pallas_call(
        _ccim_fused_kernel,
        out_shape=jax.ShapeDtypeStruct((B, 128), jnp.float32),
        in_specs=_vmem_specs(11),
        out_specs=pl.BlockSpec(memory_space=pltpu.MemorySpace.VMEM),
        cost_estimate=_cost_estimate(B, F, G, N),
    )(joint_feature, confounder, prior_row,
      params["w_query"], params["w_key"], params["w_h"], params["w_g"],
      params["fc1_w_folded"], params["fc1_b_folded"],
      params["fc2_w"], params["fc2_b"])
    return out


# ---------------------------------------------------------------------------
# Pure-JAX reference (same math; exact softmax divide) for a correctness check
# ---------------------------------------------------------------------------
def ccim_reference(joint_feature, confounder, prior, params):
    query = joint_feature @ params["w_query"]
    key = confounder @ params["w_key"]
    mid = (query @ key.T) / math.sqrt(confounder.shape[1])
    attn = jax.nn.softmax(mid, axis=-1)
    g_z = (attn[:, :, None] * confounder[None] * prior[None]).sum(1)
    do_x = joint_feature @ params["w_h"] + g_z @ params["w_g"]
    h = do_x @ params["fc1_w_folded"] + params["fc1_b_folded"]
    h = 0.5 * h * (1.0 + jnp.tanh(math.sqrt(2.0 / math.pi)
                                  * (h + 0.044715 * h ** 3)))
    y = h @ params["fc2_w"] + params["fc2_b"]
    return do_x + 0.3 * y


# ---------------------------------------------------------------------------
# Parameters (BN folded into fc1 at build time)
# ---------------------------------------------------------------------------
def fold_bn_into_fc1(fc1_w, fc1_b, gamma, beta, mean, var, eps=1e-5):
    """Inference BN(x) = x*scale + shift; fold into fc1: x @ W' + b'."""
    scale = gamma * jax.lax.rsqrt(var + eps)          # [1, 128]
    shift = beta - mean * scale                       # [1, 128]
    w_folded = scale.reshape(-1, 1) * fc1_w           # [128, 512]
    b_folded = fc1_b + shift @ fc1_w                  # [1, 512]
    return w_folded, b_folded


def make_params(key, num_joint_feature, num_gz):
    ks = jax.random.split(key, 8)

    def xavier(k, fan_in, fan_out):
        std = math.sqrt(2.0 / (fan_in + fan_out))
        return std * jax.random.normal(k, (fan_in, fan_out), jnp.float32)

    F, G = num_joint_feature, num_gz

    fc1_w = xavier(ks[4], 128, 512)
    fc1_b = 0.01 * jax.random.normal(ks[5], (1, 512), jnp.float32)
    # Fresh-init BatchNorm1d running stats / affine params.
    bn_gamma = jnp.ones((1, 128), jnp.float32)
    bn_beta = jnp.zeros((1, 128), jnp.float32)
    bn_mean = jnp.zeros((1, 128), jnp.float32)
    bn_var = jnp.ones((1, 128), jnp.float32)
    fc1_w_folded, fc1_b_folded = fold_bn_into_fc1(
        fc1_w, fc1_b, bn_gamma, bn_beta, bn_mean, bn_var)

    return {
        # dot_product_intervention
        "w_query": xavier(ks[0], F, 256),
        "w_key":   xavier(ks[1], G, 256),
        # CCIM projections
        "w_h": xavier(ks[2], F, 128),
        "w_g": xavier(ks[3], G, 128),
        # classifier (BN folded into fc1)
        "fc1_w_folded": fc1_w_folded,
        "fc1_b_folded": fc1_b_folded,
        "fc2_w": xavier(ks[6], 512, 128),
        "fc2_b": 0.01 * jax.random.normal(ks[7], (1, 128), jnp.float32),
    }


if __name__ == "__main__":
    key = jax.random.PRNGKey(0)
    B = 8                     # batch
    F = 32                    # num_joint_feature
    G = 16                    # num_gz (con_size)
    N = 8                     # number of confounders in the dictionary

    k_jf, k_conf, k_prior, k_params = jax.random.split(key, 4)
    joint_feature = jax.random.normal(k_jf, (B, F), jnp.float32)
    confounder = jax.random.normal(k_conf, (N, G), jnp.float32)
    prior_logits = jax.random.normal(k_prior, (N, 1), jnp.float32)
    prior = jax.nn.softmax(prior_logits, axis=0)          # [N, 1] probabilities

    params = make_params(k_params, F, G)

    out = ccim_forward(joint_feature, confounder, prior, params)
    jax.block_until_ready(out)
    assert out.shape == (B, 128) and out.dtype == jnp.float32
    assert bool(jnp.all(jnp.isfinite(out)))

    ref = ccim_reference(joint_feature, confounder, prior, params)
    max_err = float(jnp.max(jnp.abs(out - ref)))
    # approx reciprocal in the softmax denom -> allow a small tolerance
    assert max_err < 1e-2, f"mismatch vs reference: max |err| = {max_err}"

    print("KERNEL_OK")
</pallas_src>

<mosaic_0001>
module attributes {stable_mosaic.version = 11 : i64} {
  func.func @_ccim_fused_kernel(%arg0: memref<8x32xf32, #tpu.memory_space<vmem>>, %arg1: memref<8x16xf32, #tpu.memory_space<vmem>>, %arg2: memref<1x8xf32, #tpu.memory_space<vmem>>, %arg3: memref<32x256xf32, #tpu.memory_space<vmem>>, %arg4: memref<16x256xf32, #tpu.memory_space<vmem>>, %arg5: memref<32x128xf32, #tpu.memory_space<vmem>>, %arg6: memref<16x128xf32, #tpu.memory_space<vmem>>, %arg7: memref<128x512xf32, #tpu.memory_space<vmem>>, %arg8: memref<1x512xf32, #tpu.memory_space<vmem>>, %arg9: memref<512x128xf32, #tpu.memory_space<vmem>>, %arg10: memref<1x128xf32, #tpu.memory_space<vmem>>, %arg11: memref<8x128xf32, #tpu.memory_space<vmem>>) attributes {dimension_semantics = [], scalar_prefetch = 0 : i64, scratch_operands = 0 : i64, tpu.core_type = #tpu.core_type<tc>} {
    %c0 = arith.constant 0 : index
    %c0_0 = arith.constant 0 : index
    %0 = vector.load %arg0[%c0, %c0_0] : memref<8x32xf32, #tpu.memory_space<vmem>>, vector<8x32xf32>
    %c0_1 = arith.constant 0 : index
    %c0_2 = arith.constant 0 : index
    %1 = vector.load %arg1[%c0_1, %c0_2] : memref<8x16xf32, #tpu.memory_space<vmem>>, vector<8x16xf32>
    %c0_3 = arith.constant 0 : index
    %c0_4 = arith.constant 0 : index
    %2 = vector.load %arg2[%c0_3, %c0_4] : memref<1x8xf32, #tpu.memory_space<vmem>>, vector<1x8xf32>
    %c0_5 = arith.constant 0 : index
    %c0_6 = arith.constant 0 : index
    %3 = vector.load %arg3[%c0_5, %c0_6] : memref<32x256xf32, #tpu.memory_space<vmem>>, vector<32x256xf32>
    %cst = arith.constant dense<0.000000e+00> : vector<8x256xf32>
    %4 = tpu.matmul %0, %3, %cst {dimension_numbers = #tpu.dot_dimension_numbers<[1], [0], [0], [1], [0, 0, 1, 1], [], []>} : vector<8x32xf32>, vector<32x256xf32>, vector<8x256xf32> -> vector<8x256xf32>
    %c0_7 = arith.constant 0 : index
    %c0_8 = arith.constant 0 : index
    %5 = vector.load %arg4[%c0_7, %c0_8] : memref<16x256xf32, #tpu.memory_space<vmem>>, vector<16x256xf32>
    %cst_9 = arith.constant dense<0.000000e+00> : vector<8x256xf32>
    %6 = tpu.matmul %1, %5, %cst_9 {dimension_numbers = #tpu.dot_dimension_numbers<[1], [0], [0], [1], [0, 0, 1, 1], [], []>} : vector<8x16xf32>, vector<16x256xf32>, vector<8x256xf32> -> vector<8x256xf32>
    %cst_10 = arith.constant dense<0.000000e+00> : vector<8x8xf32>
    %7 = tpu.matmul %4, %6, %cst_10 {dimension_numbers = #tpu.dot_dimension_numbers<[1], [1], [0], [0], [0, 0, 1, 0], [], []>} : vector<8x256xf32>, vector<8x256xf32>, vector<8x8xf32> -> vector<8x8xf32>
    %cst_11 = arith.constant 2.500000e-01 : f32
    %8 = vector.broadcast %cst_11 : f32 to vector<8x8xf32>
    %9 = arith.mulf %7, %8 : vector<8x8xf32>
    %cst_12 = arith.constant dense<0xFF800000> : vector<8xf32>
    %10 = vector.multi_reduction <maximumf>, %9, %cst_12 [1] : vector<8x8xf32> to vector<8xf32>
    %11 = vector.shape_cast %10 : vector<8xf32> to vector<8x1xf32>
    %12 = vector.broadcast %11 : vector<8x1xf32> to vector<8x8xf32>
    %13 = arith.subf %9, %12 : vector<8x8xf32>
    %14 = math.exp %13 : vector<8x8xf32>
    %cst_13 = arith.constant dense<0.000000e+00> : vector<8xf32>
    %15 = vector.multi_reduction <add>, %14, %cst_13 [1] : vector<8x8xf32> to vector<8xf32>
    %16 = vector.shape_cast %15 : vector<8xf32> to vector<8x1xf32>
    %17 = tpu.reciprocal %16 {approx = true} : vector<8x1xf32> -> vector<8x1xf32>
    %18 = vector.broadcast %17 : vector<8x1xf32> to vector<8x8xf32>
    %19 = arith.mulf %14, %18 : vector<8x8xf32>
    %20 = vector.broadcast %2 : vector<1x8xf32> to vector<8x8xf32>
    %21 = arith.mulf %19, %20 : vector<8x8xf32>
    %cst_14 = arith.constant dense<0.000000e+00> : vector<8x16xf32>
    %22 = tpu.matmul %21, %1, %cst_14 {dimension_numbers = #tpu.dot_dimension_numbers<[1], [0], [0], [1], [0, 0, 1, 1], [], []>} : vector<8x8xf32>, vector<8x16xf32>, vector<8x16xf32> -> vector<8x16xf32>
    %c0_15 = arith.constant 0 : index
    %c0_16 = arith.constant 0 : index
    %23 = vector.load %arg5[%c0_15, %c0_16] : memref<32x128xf32, #tpu.memory_space<vmem>>, vector<32x128xf32>
    %cst_17 = arith.constant dense<0.000000e+00> : vector<8x128xf32>
    %24 = tpu.matmul %0, %23, %cst_17 {dimension_numbers = #tpu.dot_dimension_numbers<[1], [0], [0], [1], [0, 0, 1, 1], [], []>} : vector<8x32xf32>, vector<32x128xf32>, vector<8x128xf32> -> vector<8x128xf32>
    %c0_18 = arith.constant 0 : index
    %c0_19 = arith.constant 0 : index
    %25 = vector.load %arg6[%c0_18, %c0_19] : memref<16x128xf32, #tpu.memory_space<vmem>>, vector<16x128xf32>
    %cst_20 = arith.constant dense<0.000000e+00> : vector<8x128xf32>
    %26 = tpu.matmul %22, %25, %cst_20 {dimension_numbers = #tpu.dot_dimension_numbers<[1], [0], [0], [1], [0, 0, 1, 1], [], []>} : vector<8x16xf32>, vector<16x128xf32>, vector<8x128xf32> -> vector<8x128xf32>
    %27 = arith.addf %24, %26 : vector<8x128xf32>
    %c0_21 = arith.constant 0 : index
    %c0_22 = arith.constant 0 : index
    %28 = vector.load %arg7[%c0_21, %c0_22] : memref<128x512xf32, #tpu.memory_space<vmem>>, vector<128x512xf32>
    %cst_23 = arith.constant dense<0.000000e+00> : vector<8x512xf32>
    %29 = tpu.matmul %27, %28, %cst_23 {dimension_numbers = #tpu.dot_dimension_numbers<[1], [0], [0], [1], [0, 0, 1, 1], [], []>} : vector<8x128xf32>, vector<128x512xf32>, vector<8x512xf32> -> vector<8x512xf32>
    %c0_24 = arith.constant 0 : index
    %c0_25 = arith.constant 0 : index
    %30 = vector.load %arg8[%c0_24, %c0_25] : memref<1x512xf32, #tpu.memory_space<vmem>>, vector<1x512xf32>
    %31 = vector.broadcast %30 : vector<1x512xf32> to vector<8x512xf32>
    %32 = arith.addf %29, %31 : vector<8x512xf32>
    %cst_26 = arith.constant 5.000000e-01 : f32
    %33 = vector.broadcast %cst_26 : f32 to vector<8x512xf32>
    %34 = arith.mulf %33, %32 : vector<8x512xf32>
    %cst_27 = arith.constant 4.471500e-02 : f32
    %35 = vector.broadcast %cst_27 : f32 to vector<8x512xf32>
    %36 = arith.mulf %35, %32 : vector<8x512xf32>
    %37 = arith.mulf %36, %32 : vector<8x512xf32>
    %38 = arith.mulf %37, %32 : vector<8x512xf32>
    %39 = arith.addf %32, %38 : vector<8x512xf32>
    %cst_28 = arith.constant 0.797884583 : f32
    %40 = vector.broadcast %cst_28 : f32 to vector<8x512xf32>
    %41 = arith.mulf %40, %39 : vector<8x512xf32>
    %42 = math.tanh %41 : vector<8x512xf32>
    %cst_29 = arith.constant 1.000000e+00 : f32
    %43 = vector.broadcast %cst_29 : f32 to vector<8x512xf32>
    %44 = arith.addf %43, %42 : vector<8x512xf32>
    %45 = arith.mulf %34, %44 : vector<8x512xf32>
    %c0_30 = arith.constant 0 : index
    %c0_31 = arith.constant 0 : index
    %46 = vector.load %arg9[%c0_30, %c0_31] : memref<512x128xf32, #tpu.memory_space<vmem>>, vector<512x128xf32>
    %cst_32 = arith.constant dense<0.000000e+00> : vector<8x128xf32>
    %47 = tpu.matmul %45, %46, %cst_32 {dimension_numbers = #tpu.dot_dimension_numbers<[1], [0], [0], [1], [0, 0, 1, 1], [], []>} : vector<8x512xf32>, vector<512x128xf32>, vector<8x128xf32> -> vector<8x128xf32>
    %c0_33 = arith.constant 0 : index
    %c0_34 = arith.constant 0 : index
    %48 = vector.load %arg10[%c0_33, %c0_34] : memref<1x128xf32, #tpu.memory_space<vmem>>, vector<1x128xf32>
    %49 = vector.broadcast %48 : vector<1x128xf32> to vector<8x128xf32>
    %50 = arith.addf %47, %49 : vector<8x128xf32>
    %cst_35 = arith.constant 3.000000e-01 : f32
    %51 = vector.broadcast %cst_35 : f32 to vector<8x128xf32>
    %52 = arith.mulf %51, %50 : vector<8x128xf32>
    %53 = arith.addf %27, %52 : vector<8x128xf32>
    %c0_36 = arith.constant 0 : index
    %c0_37 = arith.constant 0 : index
    %54 = vector.load %arg11[%c0_36, %c0_37] : memref<8x128xf32, #tpu.memory_space<vmem>>, vector<8x128xf32>
    tpu.vector_store %arg11[%c0_36, %c0_37], %53 {strides = array<i32>} : memref<8x128xf32, #tpu.memory_space<vmem>>, vector<8x128xf32>,
    return
  }
}

</mosaic_0001>

<bundles_post_ra>
// kernel: ccim_forward.1
= control target key start
LH: loop header
LB: loop body
LE: loop exit
PB: predicated region body
PF: predicated region fallthrough
CT: control target
= control target key end

     0   :  { %16 = vsyncpa [#allocation3], 0  ;;  %s1609_s0 = inlined_call_operand.hbm [shape: f32[8,32], index: 0, kind: input, shape index: {}]   ;;  %s1610_s1 = inlined_call_operand.hbm [shape: f32[8,16], index: 1, kind: input, shape index: {}]   ;;  %s1611_s2 = inlined_call_operand.vmem [shape: f32[1,8], index: 2, kind: input, shape index: {}]   ;;  %s1612_s3 = inlined_call_operand.hbm [shape: f32[32,256], index: 3, kind: input, shape index: {}]   ;;  %s1613_s4 = inlined_call_operand.hbm [shape: f32[16,256], index: 4, kind: input, shape index: {}]   ;;  %s1614_s5 = inlined_call_operand.hbm [shape: f32[32,128], index: 5, kind: input, shape index: {}]   ;;  %s1615_s6 = inlined_call_operand.hbm [shape: f32[16,128], index: 6, kind: input, shape index: {}]   ;;  %s1616_s7 = inlined_call_operand.hbm [shape: f32[128,512], index: 7, kind: input, shape index: {}]   ;;  %s1617_s8 = inlined_call_operand.vmem [shape: f32[1,512], index: 8, kind: input, shape index: {}]   ;;  %s1618_s9 = inlined_call_operand.hbm [shape: f32[512,128], index: 9, kind: input, shape index: {}]   ;;  %s1619_s10 = inlined_call_operand.vmem [shape: f32[1,128], index: 10, kind: input, shape index: {}]   ;;  %s1620_s11 = inlined_call_operand.hbm [shape: f32[8,128], index: 11, kind: output, shape index: {}]  }
   0x1   :  { %17 = vsyncpa [#allocation6], 0 }
   0x2   :  { %18 = vsyncpa [#allocation9], 0 }
   0x3   :  { %19 = vsyncpa [#allocation12], 0 }
   0x4   :  { %20 = vsyncpa [#allocation15], 0 }
   0x5   :  { %21 = vsyncpa [#allocation4], 0  ;;  %s1449_s17 = smov [#allocation5]  }
   0x6   :  { %s38_s18 = sshll.u32 %s1449_s17, 4  ;;  %s39_s18 = int_to_ptr.vmem [resolvable:$true] %s38_s18 }
   0x7   :  { %s1265_s19 = scalar_lea.vmem %s39_s18, 128  ;;  %p1270_p1 = scmp.lt.s32.totalorder %s39_s18, %s39_s18 }
   0x8   :  { %p1266_p0 = scmp.ne.s32.totalorder %s39_s18, %s1265_s19  ;;  %p1271_p2 = scmp.lt.s32.totalorder %s1265_s19, %s1265_s19 }
   0xa   :  { %p1272_p3 = por %p1271_p2, %p1270_p1 }
   0xc   :  { %p1273_p4 = pnand %p1272_p3, %p1266_p0 }
   0xe   :  { %1276 = shalt.err (!%p1273_p4)
}
   0xf   :  { %41 = dma.hbm_to_vmem [thread:$0]  %s1610_s1, 128, %s39_s18, [#allocation6]  }
  0x10   :  { %s1450_s22 = smov [#allocation8]  }
  0x11   :  { %s61_s23 = sshll.u32 %s1450_s22, 4  ;;  %s62_s23 = int_to_ptr.vmem [resolvable:$true] %s61_s23 }
  0x12   :  { %s1285_s24 = scalar_lea.vmem %s62_s23, 512  ;;  %p1290_p6 = scmp.lt.s32.totalorder %s62_s23, %s62_s23 }
  0x13   :  { %p1286_p5 = scmp.ne.s32.totalorder %s62_s23, %s1285_s24  ;;  %p1291_p7 = scmp.lt.s32.totalorder %s1285_s24, %s1285_s24 }
  0x15   :  { %p1292_p8 = por %p1291_p7, %p1290_p6 }
  0x17   :  { %p1293_p9 = pnand %p1292_p8, %p1286_p5 }
  0x19   :  { %1296 = shalt.err (!%p1293_p9)
}
  0x1a   :  { %s1451_s25 = smov 256   ;;  %s1452_s26 = smov 16  }
  0x1b   :  { %67 = dma.hbm_to_vmem [thread:$0]  %s1613_s4, 512, %s62_s23, [#allocation9], %s1451_s25, %s1451_s25, %s1452_s26  }
  0x1c   :  { %s1453_s1 = smov [#allocation11]   ;;  %s1454_s30 = smov [#allocation2]  }
  0x1d   :  { %s85_s29 = sshll.u32 %s1453_s1, 4  ;;  %s28_s12 = sshll.u32 %s1454_s30, 4  ;;  %s86_s29 = int_to_ptr.vmem [resolvable:$true] %s85_s29  ;;  %s29_s12 = int_to_ptr.vmem [resolvable:$true] %s28_s12 }
  0x1e   :  { %s1305_s13 = scalar_lea.vmem %s86_s29, 256  ;;  %p1310_p11 = scmp.lt.s32.totalorder %s86_s29, %s86_s29 }
  0x1f   :  { %p1306_p10 = scmp.ne.s32.totalorder %s86_s29, %s1305_s13  ;;  %p1311_p12 = scmp.lt.s32.totalorder %s1305_s13, %s1305_s13 }
  0x21   :  { %p1312_p13 = por %p1311_p12, %p1310_p11 }
  0x23   :  { %p1313_p0 = pnand %p1312_p13, %p1306_p10 }
  0x25   :  { %1316 = shalt.err (!%p1313_p0)
}
  0x26   :  { %s1455_s14 = smov 128   ;;  %s1456_s15 = smov 8  }
  0x27   :  { %91 = dma.hbm_to_vmem [thread:$0]  %s1615_s6, 256, %s86_s29, [#allocation12], %s1455_s14, %s1455_s14, %s1456_s15  }
  0x28   :  { %s1325_s17 = scalar_lea.vmem %s29_s12, 128  ;;  %p1330_p2 = scmp.lt.s32.totalorder %s29_s12, %s29_s12 }
  0x29   :  { %p1326_p1 = scmp.ne.s32.totalorder %s29_s12, %s1325_s17  ;;  %p1331_p3 = scmp.lt.s32.totalorder %s1325_s17, %s1325_s17 }
  0x2b   :  { %p1332_p4 = por %p1331_p3, %p1330_p2 }
  0x2d   :  { %p1333_p5 = pnand %p1332_p4, %p1326_p1 }
  0x2f   :  { %1336 = shalt.err (!%p1333_p5)
}
  0x30   :  { %31 = dma.hbm_to_vmem [thread:$0]  %s1609_s0, 128, %s29_s12, [#allocation3]  }
  0x31   :  { %s1457_s20 = smov [#allocation7]   ;;  %s1458_s22 = smov [#allocation10]  }
  0x32   :  { %s49_s21 = sshll.u32 %s1457_s20, 4  ;;  %s73_s23 = sshll.u32 %s1458_s22, 4  ;;  %s50_s21 = int_to_ptr.vmem [resolvable:$true] %s49_s21  ;;  %s74_s23 = int_to_ptr.vmem [resolvable:$true] %s73_s23 }
  0x33   :  { %s1345_s24 = scalar_lea.vmem %s50_s21, 1024  ;;  %p1350_p7 = scmp.lt.s32.totalorder %s50_s21, %s50_s21 }
  0x34   :  { %p1346_p6 = scmp.ne.s32.totalorder %s50_s21, %s1345_s24  ;;  %p1351_p8 = scmp.lt.s32.totalorder %s1345_s24, %s1345_s24 }
  0x36   :  { %p1352_p9 = por %p1351_p8, %p1350_p7 }
  0x38   :  { %p1353_p10 = pnand %p1352_p9, %p1346_p6 }
  0x3a   :  { %1356 = shalt.err (!%p1353_p10)
}
  0x3b   :  { %55 = dma.hbm_to_vmem [thread:$0]  %s1612_s3, 1024, %s50_s21, [#allocation6], %s1451_s25, %s1451_s25, %s1452_s26  }
  0x3c   :  { %s1365_s0 = scalar_lea.vmem %s74_s23, 512  ;;  %p1370_p12 = scmp.lt.s32.totalorder %s74_s23, %s74_s23 }
  0x3d   :  { %p1366_p11 = scmp.ne.s32.totalorder %s74_s23, %s1365_s0  ;;  %p1371_p13 = scmp.lt.s32.totalorder %s1365_s0, %s1365_s0 }
  0x3f   :  { %p1372_p0 = por %p1371_p13, %p1370_p12 }
  0x41   :  { %p1373_p1 = pnand %p1372_p0, %p1366_p11 }
  0x43   :  { %1376 = shalt.err (!%p1373_p1)
}
  0x44   :  { %79 = dma.hbm_to_vmem [thread:$0]  %s1614_s5, 512, %s74_s23, [#allocation9], %s1455_s14, %s1455_s14, %s1456_s15  }
  0x45   :  { %s1459_s29 = smov [#allocation13]  }
  0x46   :  { %s97_s30 = sshll.u32 %s1459_s29, 4  ;;  %s98_s30 = int_to_ptr.vmem [resolvable:$true] %s97_s30 }
  0x47   :  { %s1385_s12 = scalar_lea.vmem %s98_s30, 8192  ;;  %p1390_p3 = scmp.lt.s32.totalorder %s98_s30, %s98_s30 }
  0x48   :  { %p1386_p2 = scmp.ne.s32.totalorder %s98_s30, %s1385_s12  ;;  %p1391_p4 = scmp.lt.s32.totalorder %s1385_s12, %s1385_s12 }
  0x4a   :  { %p1392_p5 = por %p1391_p4, %p1390_p3 }
  0x4c   :  { %p1393_p6 = pnand %p1392_p5, %p1386_p2 }
  0x4e   :  { %1396 = shalt.err (!%p1393_p6)
}
  0x4f   :  { %s1460_s3 = smov 512   ;;  %s1461_s25 = smov 32  }
  0x50   :  { %103 = dma.hbm_to_vmem [thread:$0]  %s1616_s7, 8192, %s98_s30, [#allocation12], %s1460_s3, %s1460_s3, %s1461_s25  }
  0x51   :  { %s1462_s16 = smov [#allocation14]  }
  0x52   :  { %s111_s4 = sshll.u32 %s1462_s16, 4  ;;  %s112_s4 = int_to_ptr.vmem [resolvable:$true] %s111_s4 }
  0x53   :  { %s1405_s5 = scalar_lea.vmem %s112_s4, 8192  ;;  %p1410_p8 = scmp.lt.s32.totalorder %s112_s4, %s112_s4 }
  0x54   :  { %p1406_p7 = scmp.ne.s32.totalorder %s112_s4, %s1405_s5  ;;  %p1411_p9 = scmp.lt.s32.totalorder %s1405_s5, %s1405_s5 }
  0x56   :  { %p1412_p10 = por %p1411_p9, %p1410_p8 }
  0x58   :  { %p1413_p11 = pnand %p1412_p10, %p1406_p7 }
  0x5a   :  { %1416 = shalt.err (!%p1413_p11)
}
  0x5b   :  { %117 = dma.hbm_to_vmem [thread:$0]  %s1618_s9, 8192, %s112_s4, [#allocation15], %s1455_s14, %s1455_s14, %s1456_s15  }
  0x5c   :  { %1437 = dma.done.wait [#allocation3], 128  }
  0x5d   :  { %1438 = vsyncadd [#allocation3], 4294967168 }
  0x5e   :  { %1439 = dma.done.wait [#allocation6], 1152  }
  0x5f   :  { %1440 = vsyncadd [#allocation6], 4294966144 }
  0x60   :  { %1441 = dma.done.wait [#allocation9], 1024  }
  0x61   :  { %1442 = vsyncadd [#allocation9], 4294966272 }
  0x62   :  { %1443 = dma.done.wait [#allocation12], 8448  }
  0x63   :  { %1444 = vsyncadd [#allocation12], 4294958848 }
  0x64   :  { %1445 = dma.done.wait [#allocation15], 8192  }
  0x65   :  { %1446 = vsyncadd [#allocation15], 4294959104  ;;  %v1463_v0 = vmov 0.0   ;;  %v154_v1 = vld [vmem:[#allocation7 + $0x38] sm:$0xff]  ;;  %v153_v3 = vld [vmem:[#allocation7 + $0x30] sm:$0xff]  ;;  %vm234_vm0 = vcmask 130048  }
  0x66   :  { %302 = vmatprep.mubr.f32.mxu1 %v1463_v0  ;;  %223 = vmatprep.mubr.f32.mxu0 %v1463_v0  ;;  %v233_v2 = vld [vmem:[#allocation8 + $0x18] sm:$0xff]  ;;  %v232_v4 = vld [vmem:[#allocation8 + $0x10] sm:$0xff]  ;;  %v152_v5 = vld [vmem:[#allocation7 + $0x28] sm:$0xff]  ;;  %vm155_vm1 = vcmask 261120   ;;  %vm380_vm2 = vcmask 64512   ;;  %vm1464_vm3 = vmmov 0  }
  0x67   :  { %183 = vmatprep.subr.mxu0 %v154_v1  ;;  %266 = vmatprep.subr.mxu1 %v233_v2  ;;  %v231_v6 = vld [vmem:[#allocation8 + $0x8] sm:$0xff]  ;;  %v151_v7 = vld [vmem:[#allocation7 + $0x20] sm:$0xff]  ;;  %v150_v9 = vld [vmem:[#allocation7 + $0x18] sm:$0xff]  ;;  %s1465_s19 = smov [#allocation16]  }
  0x68   :  { %184 = vmatpush1.msra.mxu0 %v153_v3  ;;  %267 = vmatpush1.msra.mxu1 %v232_v4  ;;  %v230_v8 = vld [vmem:[#allocation8] sm:$0xff]  ;;  %v145_v10 = vld [vmem:[#allocation5] sm:$0xff]  ;;  %v149_v11 = vld [vmem:[#allocation7 + $0x10] sm:$0xff]  ;;  %s1105_s20 = sshll.u32 %s1465_s19, 4  ;;  %s1106_s20 = int_to_ptr.vmem [resolvable:$true] %s1105_s20 }
  0x69   :  { %185 = vmatprep.subr.mxu0 %v152_v5  ;;  %268 = vmatprep.subr.mxu1 %v231_v6  ;;  %v148_v12 = vld [vmem:[#allocation7 + $0x8] sm:$0xff]  ;;  %v147_v13 = vld [vmem:[#allocation7] sm:$0xff]  ;;  %v144_v14 = vld [vmem:[#allocation2] sm:$0xff]  ;;  %s1417_s21 = scalar_lea.vmem %s1106_s20, 128  ;;  %p1422_p13 = scmp.lt.s32.totalorder %s1106_s20, %s1106_s20 }
  0x6a   :  { %186 = vmatpush1.msra.mxu0 %v151_v7  ;;  %269 = vmatpush1.msra.mxu1 %v230_v8  ;;  %v475_v28 = vld [vmem:[#allocation10 + $0x18] sm:$0xff]  ;;  %v474_v29 = vld [vmem:[#allocation10 + $0x10] sm:$0xff]  ;;  %v473_v30 = vld [vmem:[#allocation10 + $0x8] sm:$0xff]  ;;  %p1418_p12 = scmp.ne.s32.totalorder %s1106_s20, %s1417_s21  ;;  %p1423_p0 = scmp.lt.s32.totalorder %s1417_s21, %s1417_s21 }
  0x6b   :  { %187 = vmatprep.subr.mxu0 %v150_v9  ;;  %1119 = vmatmul.mubr.msk.f32.vlgmr.msra.gmra.mxu1 %vm234_vm0, %v145_v10  ;;  %v472_v31 = vld [vmem:[#allocation10] sm:$0xff]  ;;  %v1120_v34 = vld [vmem:[%s1611_s2] ss:$0 sm:$0xff]  ;;  %v477_v37 = vld [vmem:[#allocation11 + $0x8] sm:$0xff] }
  0x6c   :  { %188 = vmatpush1.msra.mxu0 %v149_v11  ;;  %v476_v38 = vld [vmem:[#allocation11] sm:$0xff]  ;;  %v682_v39 = vld [vmem:[#allocation13 + $0x1e8] sm:$0xff]  ;;  %v684_v40 = vld [vmem:[#allocation13 + $0x1f8] sm:$0xff]  ;;  %p1424_p1 = por %p1423_p0, %p1422_p13 }
  0x6d   :  { %189 = vmatprep.subr.mxu0 %v148_v12  ;;  %v683_v41 = vld [vmem:[#allocation13 + $0x1f0] sm:$0xff]  ;;  %v680_v42 = vld [vmem:[#allocation13 + $0x1d8] sm:$0xff]  ;;  %v681_v8 = vld [vmem:[#allocation13 + $0x1e0] sm:$0xff] }
  0x6e   :  { %190 = vmatpush1.msra.mxu0 %v147_v13  ;;  %v679_v43 = vld [vmem:[#allocation13 + $0x1d0] sm:$0xff]  ;;  %v676_v44 = vld [vmem:[#allocation13 + $0x1b8] sm:$0xff]  ;;  %v677_v11 = vld [vmem:[#allocation13 + $0x1c0] sm:$0xff]  ;;  %p1425_p2 = pnand %p1424_p1, %p1418_p12 }
  0x6f   :  { %1118 = vmatmul.mubr.msk.f32.vlgmr.msra.gmra.mxu0 %vm155_vm1, %v144_v14  ;;  %1217 = vmatprep.subr.mxu0 %v1463_v0  ;;  %v675_v45 = vld [vmem:[#allocation13 + $0x1b0] sm:$0xff]  ;;  %v672_v46 = vld [vmem:[#allocation13 + $0x198] sm:$0xff]  ;;  %v674_v13 = vld [vmem:[#allocation13 + $0x1a8] sm:$0xff] }
  0x70   :  { %1225 = vmatprep.mubr.msk.f32.mxu0 %vm1464_vm3, %v1463_v0  ;;  %1218 = vmatpush3.msra.mxu0 %v475_v28  ;;  %v671_v47 = vld [vmem:[#allocation13 + $0x190] sm:$0xff]  ;;  %v668_v48 = vld [vmem:[#allocation13 + $0x178] sm:$0xff]  ;;  %v642_v28 = vld [vmem:[#allocation13 + $0xa8] sm:$0xff] }
  0x71   :  { %1219 = vmatprep.subr.mxu0 %v1463_v0  ;;  %v667_v49 = vld [vmem:[#allocation13 + $0x170] sm:$0xff]  ;;  %v664_v50 = vld [vmem:[#allocation13 + $0x158] sm:$0xff] }
  0x72   :  { %1220 = vmatpush3.msra.mxu0 %v474_v29  ;;  %v663_v51 = vld [vmem:[#allocation13 + $0x150] sm:$0xff]  ;;  %v660_v52 = vld [vmem:[#allocation13 + $0x138] sm:$0xff]  ;;  %v641_v29 = vld [vmem:[#allocation13 + $0xa0] sm:$0xff] }
  0x73   :  { %1221 = vmatprep.subr.mxu0 %v1463_v0  ;;  %v659_v53 = vld [vmem:[#allocation13 + $0x130] sm:$0xff]  ;;  %v656_v54 = vld [vmem:[#allocation13 + $0x118] sm:$0xff] }
  0x74   :  { %1222 = vmatpush3.msra.mxu0 %v473_v30  ;;  %v655_v55 = vld [vmem:[#allocation13 + $0x110] sm:$0xff]  ;;  %v652_v56 = vld [vmem:[#allocation13 + $0xf8] sm:$0xff]  ;;  %v638_v30 = vld [vmem:[#allocation13 + $0x88] sm:$0xff] }
  0x75   :  { %1223 = vmatprep.subr.mxu0 %v1463_v0  ;;  %v651_v57 = vld [vmem:[#allocation13 + $0xf0] sm:$0xff]  ;;  %v648_v58 = vld [vmem:[#allocation13 + $0xd8] sm:$0xff] }
  0x76   :  { %1224 = vmatpush3.msra.mxu0 %v472_v31  ;;  %v647_v59 = vld [vmem:[#allocation13 + $0xd0] sm:$0xff]  ;;  %v644_v60 = vld [vmem:[#allocation13 + $0xb8] sm:$0xff]  ;;  %v637_v31 = vld [vmem:[#allocation13 + $0x80] sm:$0xff] }
  0x77   :  { %1226 = vmatmul.mubr.msk.f32.vlgmr.msra.gmra.mxu0 %vm155_vm1, %v144_v14  ;;  %778 = vmatprep.subr.mxu0 %v684_v40  ;;  %v643_v61 = vld [vmem:[#allocation13 + $0xb0] sm:$0xff]  ;;  %v640_v62 = vld [vmem:[#allocation13 + $0x98] sm:$0xff]  ;;  %v673_v14 = vld [vmem:[#allocation13 + $0x1a0] sm:$0xff] }
  0x78   :  { %842 = vmatprep.mubr.f32.mxu0 %v1463_v0  ;;  %779 = vmatpush1.msra.mxu0 %v683_v41  ;;  %v639_v63 = vld [vmem:[#allocation13 + $0x90] sm:$0xff]  ;;  %v636_v1 = vld [vmem:[#allocation13 + $0x78] sm:$0xff]  ;;  %v621_v41 = vld [vmem:[#allocation13] sm:$0xff] }
  0x79   :  { %780 = vmatprep.subr.mxu0 %v680_v42  ;;  %v635_v2 = vld [vmem:[#allocation13 + $0x70] sm:$0xff]  ;;  %v632_v3 = vld [vmem:[#allocation13 + $0x58] sm:$0xff] }
  0x7a   :  { %781 = vmatpush1.msra.mxu0 %v679_v43  ;;  %v631_v5 = vld [vmem:[#allocation13 + $0x50] sm:$0xff]  ;;  %v628_v6 = vld [vmem:[#allocation13 + $0x38] sm:$0xff] }
  0x7b   :  { %782 = vmatprep.subr.mxu0 %v676_v44  ;;  %v624_v40 = vld [vmem:[#allocation13 + $0x18] sm:$0xff]  ;;  %v623_v42 = vld [vmem:[#allocation13 + $0x10] sm:$0xff] }
  0x7c   :  { %783 = vmatpush1.msra.mxu0 %v675_v45 }
  0x7d   :  { %784 = vmatprep.subr.mxu0 %v672_v46  ;;  %v916_v46 = vld [vmem:[#allocation14 + $0xf8] sm:$0xff] }
  0x7e   :  { %785 = vmatpush1.msra.mxu0 %v671_v47  ;;  %v948_v47 = vld [vmem:[#allocation14 + $0x1f8] sm:$0xff] }
  0x7f   :  { %786 = vmatprep.subr.mxu0 %v668_v48  ;;  %v900_v48 = vld [vmem:[#allocation14 + $0x78] sm:$0xff] }
  0x80   :  { %787 = vmatpush1.msra.mxu0 %v667_v49  ;;  %v932_v49 = vld [vmem:[#allocation14 + $0x178] sm:$0xff] }
  0x81   :  { %788 = vmatprep.subr.mxu0 %v664_v50  ;;  %v915_v50 = vld [vmem:[#allocation14 + $0xf0] sm:$0xff] }
  0x82   :  { %789 = vmatpush1.msra.mxu0 %v663_v51  ;;  %v947_v51 = vld [vmem:[#allocation14 + $0x1f0] sm:$0xff] }
  0x83   :  { %790 = vmatprep.subr.mxu0 %v660_v52  ;;  %v899_v52 = vld [vmem:[#allocation14 + $0x70] sm:$0xff] }
  0x84   :  { %791 = vmatpush1.msra.mxu0 %v659_v53  ;;  %v931_v53 = vld [vmem:[#allocation14 + $0x170] sm:$0xff] }
  0x85   :  { %792 = vmatprep.subr.mxu0 %v656_v54  ;;  %v914_v54 = vld [vmem:[#allocation14 + $0xe8] sm:$0xff] }
  0x86   :  { %793 = vmatpush1.msra.mxu0 %v655_v55  ;;  %v946_v55 = vld [vmem:[#allocation14 + $0x1e8] sm:$0xff] }
  0x87   :  { %794 = vmatprep.subr.mxu0 %v652_v56  ;;  %v898_v56 = vld [vmem:[#allocation14 + $0x68] sm:$0xff] }
  0x88   :  { %795 = vmatpush1.msra.mxu0 %v651_v57  ;;  %v930_v57 = vld [vmem:[#allocation14 + $0x168] sm:$0xff] }
  0x89   :  { %796 = vmatprep.subr.mxu0 %v648_v58  ;;  %v913_v58 = vld [vmem:[#allocation14 + $0xe0] sm:$0xff] }
  0x8a   :  { %797 = vmatpush1.msra.mxu0 %v647_v59  ;;  %v945_v59 = vld [vmem:[#allocation14 + $0x1e0] sm:$0xff] }
  0x8b   :  { %798 = vmatprep.subr.mxu0 %v644_v60  ;;  %v897_v60 = vld [vmem:[#allocation14 + $0x60] sm:$0xff] }
  0x8c   :  { %799 = vmatpush1.msra.mxu0 %v643_v61  ;;  %v929_v61 = vld [vmem:[#allocation14 + $0x160] sm:$0xff] }
  0x8d   :  { %800 = vmatprep.subr.mxu0 %v640_v62  ;;  %v912_v62 = vld [vmem:[#allocation14 + $0xd8] sm:$0xff] }
  0x8e   :  { %801 = vmatpush1.msra.mxu0 %v639_v63  ;;  %v944_v63 = vld [vmem:[#allocation14 + $0x1d8] sm:$0xff] }
  0x8f   :  { %802 = vmatprep.subr.mxu0 %v636_v1  ;;  %v896_v1 = vld [vmem:[#allocation14 + $0x58] sm:$0xff] }
  0x90   :  { %803 = vmatpush1.msra.mxu0 %v635_v2  ;;  %v928_v2 = vld [vmem:[#allocation14 + $0x158] sm:$0xff] }
  0x91   :  { %804 = vmatprep.subr.mxu0 %v632_v3  ;;  %v911_v3 = vld [vmem:[#allocation14 + $0xd0] sm:$0xff] }
  0x92   :  { %805 = vmatpush1.msra.mxu0 %v631_v5  ;;  %v895_v5 = vld [vmem:[#allocation14 + $0x50] sm:$0xff] }
  0x93   :  { %806 = vmatprep.subr.mxu0 %v628_v6  ;;  %v927_v6 = vld [vmem:[#allocation14 + $0x150] sm:$0xff] }
 0x12b   :  { %v304_v15 = vpop.f32.mrf.mxu1 }
 0x12d   :  { %v306_v16 = vpop.f32.mrf.mxu1 }
 0x12e   :  { %339 = vmatprep.subr.mxu1 %v306_v16  ;;  %v669_v16 = vld [vmem:[#allocation13 + $0x180] sm:$0xff] }
 0x12f   :  { %v225_v17 = vpop.f32.mrf.mxu0  ;;  %340 = vmatpush1.xpose.msra.mxu1 %v304_v15  ;;  %v670_v15 = vld [vmem:[#allocation13 + $0x188] sm:$0xff] }
 0x130   :  { %1205 = vmatprep.subr.mxu1 %v1463_v0 }
 0x131   :  { %v227_v18 = vpop.f32.mrf.mxu0 }
 0x132   :  { %373 = vmatprep.mubr.f32.mxu1 %v227_v18  ;;  %v665_v18 = vld [vmem:[#allocation13 + $0x160] sm:$0xff] }
 0x133   :  { %374 = vmatmul.mubr.f32.vlgmr.msra.gmra.mxu1 %v225_v17  ;;  %v666_v17 = vld [vmem:[#allocation13 + $0x168] sm:$0xff] }
 0x134   :  { %1206 = vmatpush3.msra.mxu1 %v145_v10  ;;  %1207 = vmatprep.mubr.msk.f32.mxu1 %vm1464_vm3, %v1463_v0  ;;  %v678_v10 = vld [vmem:[#allocation13 + $0x1c8] sm:$0xff] }
 0x135   :  { %1210 = vmatprep.subr.mxu1 %v1463_v0 }
 0x137   :  { %v1590_v4 = vpop.f32.mrf.mxu0 }
 0x139   :  { %v1227_v7 = vpop.f32.mrf.mxu0 }
 0x13a   :  { %v910_v7 = vld [vmem:[#allocation14 + $0xc8] sm:$0xff] }
 0x1f3   :  { %v375_v19 = vpop.f32.mrf.mxu1 }
 0x1f4   :  { %v379_v20 = vmul.f32 0.25, %v375_v19  ;;  %v662_v19 = vld [vmem:[#allocation13 + $0x148] sm:$0xff] }
 0x1f5   :  { %v377_v21 = vpop.f32.mrf.mxu1 }
 0x1f6   :  { %v381_v22 = vsel %vm380_vm2, %v379_v20, -inf  ;;  %v658_v21 = vld [vmem:[#allocation13 + $0x128] sm:$0xff] }
 0x1f7   :  { %382 = vmax.xlane.f32.xlu0 %v381_v22  ;;  %v657_v22 = vld [vmem:[#allocation13 + $0x120] sm:$0xff] }
 0x280   :  { %v383_v23 = vpop.xlane.xlu0 %382 }
 0x281   :  { %v384_v24 = vsub.f32 %v379_v20, %v383_v23  ;;  %v661_v20 = vld [vmem:[#allocation13 + $0x140] sm:$0xff] }
 0x282   :  { %v653_v23 = vld [vmem:[#allocation13 + $0x100] sm:$0xff] }
 0x283   :  { %v385_v25 = vmul.f32 1.442695, %v384_v24  ;;  %v650_v24 = vld [vmem:[#allocation13 + $0xe8] sm:$0xff] }
 0x285   :  { %1245 = vpow2.f32 %v385_v25  ;;  %v649_v25 = vld [vmem:[#allocation13 + $0xe0] sm:$0xff] }
 0x292   :  { %v1246_v26 = vpop.eup %1245 }
 0x293   :  { %v387_v27 = vsel %vm380_vm2, %v1246_v26, 0.0 }
 0x294   :  { %388 = vadd.xlane.f32.xlu0 %v387_v27  ;;  %v645_v27 = vld [vmem:[#allocation13 + $0xc0] sm:$0xff] }
 0x31d   :  { %v389_v32 = vpop.xlane.xlu0 %388 }
 0x31e   :  { %1247 = vrcp.f32 %v389_v32  ;;  %v634_v32 = vld [vmem:[#allocation13 + $0x68] sm:$0xff] }
 0x32b   :  { %v1248_v33 = vpop.eup %1247 }
 0x32c   :  { %v391_v35 = vmul.f32 %v1248_v33, %v1246_v26  ;;  %v646_v26 = vld [vmem:[#allocation13 + $0xc8] sm:$0xff]  ;;  %v633_v33 = vld [vmem:[#allocation13 + $0x60] sm:$0xff] }
 0x32e   :  { %v398_v36 = vmul.f32 %v1120_v34, %v391_v35  ;;  %v630_v34 = vld [vmem:[#allocation13 + $0x48] sm:$0xff]  ;;  %v629_v35 = vld [vmem:[#allocation13 + $0x40] sm:$0xff] }
 0x330   :  { %1208 = vmatmul.mubr.msk.f32.vlgmr.msra.gmra.mxu1 %vm380_vm2, %v398_v36  ;;  %v626_v36 = vld [vmem:[#allocation13 + $0x28] sm:$0xff] }
 0x331   :  { %1211 = vmatpush3.msra.mxu1 %v477_v37  ;;  %1214 = vmatprep.mubr.msk.f32.mxu1 %vm1464_vm3, %v1463_v0  ;;  %v625_v37 = vld [vmem:[#allocation13 + $0x20] sm:$0xff] }
 0x332   :  { %1212 = vmatprep.subr.mxu1 %v1463_v0 }
 0x333   :  { %1213 = vmatpush3.msra.mxu1 %v476_v38  ;;  %v627_v38 = vld [vmem:[#allocation13 + $0x30] sm:$0xff] }
 0x334   :  { %707 = vmatprep.subr.mxu1 %v682_v39  ;;  %807 = vmatpush1.msra.mxu0 %v627_v38  ;;  %v622_v39 = vld [vmem:[#allocation13 + $0x8] sm:$0xff] }
 0x335   :  { %808 = vmatprep.subr.mxu0 %v624_v40  ;;  %v902_v38 = vld [vmem:[#allocation14 + $0x88] sm:$0xff] }
 0x336   :  { %809 = vmatpush1.msra.mxu0 %v623_v42  ;;  %v886_v40 = vld [vmem:[#allocation14 + $0x8] sm:$0xff]  ;;  %v901_v42 = vld [vmem:[#allocation14 + $0x80] sm:$0xff] }
 0x337   :  { %1170 = vmatprep.subr.mxu0 %v948_v47  ;;  %v687_v47 = vlaneseq }
 0x3f0   :  { %v468_v9 = vpop.f32.mrf.mxu1 }
 0x3f1   :  { %1215 = vmatmul.mubr.msk.f32.vlgmr.msra.gmra.mxu1 %vm234_vm0, %v468_v9  ;;  %v894_v9 = vld [vmem:[#allocation14 + $0x48] sm:$0xff] }
 0x3f2   :  { %v1209_v12 = vpop.f32.mrf.mxu1  ;;  %708 = vmatpush1.msra.mxu1 %v681_v8  ;;  %771 = vmatprep.mubr.f32.mxu1 %v1463_v0  ;;  %v654_v0 = vld [vmem:[#allocation13 + $0x108] sm:$0xff] }
 0x3f3   :  { %709 = vmatprep.subr.mxu1 %v678_v10  ;;  %v942_v8 = vld [vmem:[#allocation14 + $0x1c8] sm:$0xff]  ;;  %v941_v12 = vld [vmem:[#allocation14 + $0x1c0] sm:$0xff] }
 0x3f4   :  { %710 = vmatpush1.msra.mxu1 %v677_v11  ;;  %v926_v10 = vld [vmem:[#allocation14 + $0x148] sm:$0xff]  ;;  %v909_v11 = vld [vmem:[#allocation14 + $0xc0] sm:$0xff] }
 0x3f5   :  { %711 = vmatprep.subr.mxu1 %v674_v13  ;;  %v893_v13 = vld [vmem:[#allocation14 + $0x40] sm:$0xff] }
 0x3f6   :  { %712 = vmatpush1.msra.mxu1 %v673_v14  ;;  %v925_v14 = vld [vmem:[#allocation14 + $0x140] sm:$0xff] }
 0x3f7   :  { %713 = vmatprep.subr.mxu1 %v670_v15  ;;  %v908_v15 = vld [vmem:[#allocation14 + $0xb8] sm:$0xff] }
 0x3f8   :  { %714 = vmatpush1.msra.mxu1 %v669_v16  ;;  %v940_v16 = vld [vmem:[#allocation14 + $0x1b8] sm:$0xff] }
 0x3f9   :  { %715 = vmatprep.subr.mxu1 %v666_v17  ;;  %v892_v17 = vld [vmem:[#allocation14 + $0x38] sm:$0xff] }
 0x3fa   :  { %716 = vmatpush1.msra.mxu1 %v665_v18  ;;  %v924_v18 = vld [vmem:[#allocation14 + $0x138] sm:$0xff] }
 0x3fb   :  { %717 = vmatprep.subr.mxu1 %v662_v19  ;;  %v907_v19 = vld [vmem:[#allocation14 + $0xb0] sm:$0xff] }
 0x3fc   :  { %718 = vmatpush1.msra.mxu1 %v661_v20  ;;  %v939_v20 = vld [vmem:[#allocation14 + $0x1b0] sm:$0xff] }
 0x3fd   :  { %719 = vmatprep.subr.mxu1 %v658_v21  ;;  %v891_v21 = vld [vmem:[#allocation14 + $0x30] sm:$0xff] }
 0x3fe   :  { %720 = vmatpush1.msra.mxu1 %v657_v22  ;;  %v923_v22 = vld [vmem:[#allocation14 + $0x130] sm:$0xff] }
 0x3ff   :  { %721 = vmatprep.subr.mxu1 %v654_v0  ;;  %v906_v0 = vld [vmem:[#allocation14 + $0xa8] sm:$0xff] }
 0x400   :  { %722 = vmatpush1.msra.mxu1 %v653_v23  ;;  %v938_v23 = vld [vmem:[#allocation14 + $0x1a8] sm:$0xff] }
 0x401   :  { %723 = vmatprep.subr.mxu1 %v650_v24  ;;  %v890_v24 = vld [vmem:[#allocation14 + $0x28] sm:$0xff] }
 0x402   :  { %724 = vmatpush1.msra.mxu1 %v649_v25  ;;  %v922_v25 = vld [vmem:[#allocation14 + $0x128] sm:$0xff] }
 0x403   :  { %725 = vmatprep.subr.mxu1 %v646_v26  ;;  %v905_v26 = vld [vmem:[#allocation14 + $0xa0] sm:$0xff] }
 0x404   :  { %726 = vmatpush1.msra.mxu1 %v645_v27  ;;  %v937_v27 = vld [vmem:[#allocation14 + $0x1a0] sm:$0xff] }
 0x405   :  { %727 = vmatprep.subr.mxu1 %v642_v28  ;;  %v889_v28 = vld [vmem:[#allocation14 + $0x20] sm:$0xff] }
 0x406   :  { %728 = vmatpush1.msra.mxu1 %v641_v29  ;;  %v921_v29 = vld [vmem:[#allocation14 + $0x120] sm:$0xff] }
 0x407   :  { %729 = vmatprep.subr.mxu1 %v638_v30  ;;  %v904_v30 = vld [vmem:[#allocation14 + $0x98] sm:$0xff] }
 0x408   :  { %730 = vmatpush1.msra.mxu1 %v637_v31  ;;  %v936_v31 = vld [vmem:[#allocation14 + $0x198] sm:$0xff] }
 0x409   :  { %731 = vmatprep.subr.mxu1 %v634_v32  ;;  %v888_v32 = vld [vmem:[#allocation14 + $0x18] sm:$0xff] }
 0x40a   :  { %732 = vmatpush1.msra.mxu1 %v633_v33  ;;  %v920_v33 = vld [vmem:[#allocation14 + $0x118] sm:$0xff] }
 0x40b   :  { %733 = vmatprep.subr.mxu1 %v630_v34  ;;  %v903_v34 = vld [vmem:[#allocation14 + $0x90] sm:$0xff] }
 0x40c   :  { %734 = vmatpush1.msra.mxu1 %v629_v35  ;;  %v935_v35 = vld [vmem:[#allocation14 + $0x190] sm:$0xff] }
 0x40d   :  { %735 = vmatprep.subr.mxu1 %v626_v36  ;;  %v887_v36 = vld [vmem:[#allocation14 + $0x10] sm:$0xff] }
 0x40e   :  { %736 = vmatpush1.msra.mxu1 %v625_v37  ;;  %v919_v37 = vld [vmem:[#allocation14 + $0x110] sm:$0xff] }
 0x40f   :  { %737 = vmatprep.subr.mxu1 %v622_v39  ;;  %v934_v39 = vld [vmem:[#allocation14 + $0x188] sm:$0xff] }
 0x410   :  { %738 = vmatpush1.msra.mxu1 %v621_v41  ;;  %v918_v41 = vld [vmem:[#allocation14 + $0x108] sm:$0xff] }
 0x411   :  { %1135 = vmatprep.subr.mxu1 %v916_v46  ;;  %v917_v46 = vld [vmem:[#allocation14 + $0x100] sm:$0xff] }
 0x4b1   :  { %v547_v43 = vpop.f32.mrf.mxu1 }
 0x4b2   :  { %v1595_v44 = vadd.f32 %v1590_v4, %v547_v43  ;;  %v943_v4 = vld [vmem:[#allocation14 + $0x1d0] sm:$0xff]  ;;  %v933_v43 = vld [vmem:[#allocation14 + $0x180] sm:$0xff] }
 0x4b3   :  { %v1216_v45 = vpop.f32.mrf.mxu1 }
 0x4b4   :  { %772 = vmatmul.mubr.f32.vlgmr.msra.gmra.mxu1 %v1595_v44  ;;  %843 = vmatmul.mubr.f32.vlgmr.msra.gmra.mxu0 %v1595_v44  ;;  %v885_v45 = vld [vmem:[#allocation14] sm:$0xff] }
 0x4b5   :  { %1136 = vmatpush3.msra.mxu1 %v900_v48  ;;  %1171 = vmatpush3.msra.mxu0 %v932_v49  ;;  %v688_v48 = vshrl.u32 %v687_v47, 7 }
 0x4b6   :  { %1137 = vmatprep.subr.mxu1 %v915_v50  ;;  %1172 = vmatprep.subr.mxu0 %v947_v51  ;;  %v685_v51 = vld [vmem:[%s1617_s8] sm:$0xf] }
 0x4b7   :  { %1138 = vmatpush3.msra.mxu1 %v899_v52  ;;  %1173 = vmatpush3.msra.mxu0 %v931_v53  ;;  %v689_v49 = vsub.s32 0, %v688_v48  ;;  %v697_v50 = vsub.s32 2, %v688_v48  ;;  %v693_v52 = vsub.s32 1, %v688_v48  ;;  %v701_v53 = vsub.s32 3, %v688_v48 }
 0x4b8   :  { %1139 = vmatprep.subr.mxu1 %v914_v54  ;;  %1174 = vmatprep.subr.mxu0 %v946_v55 }
 0x4b9   :  { %1140 = vmatpush3.msra.mxu1 %v898_v56  ;;  %1175 = vmatpush3.msra.mxu0 %v930_v57  ;;  %v690_v54 = vrot.slane %v685_v51, %v689_v49  ;;  %v698_v55 = vrot.slane %v685_v51, %v697_v50  ;;  %v694_v56 = vrot.slane %v685_v51, %v693_v52 }
 0x4ba   :  { %1141 = vmatprep.subr.mxu1 %v913_v58  ;;  %1176 = vmatprep.subr.mxu0 %v945_v59  ;;  %v702_v57 = vrot.slane %v685_v51, %v701_v53 }
 0x4bb   :  { %1142 = vmatpush3.msra.mxu1 %v897_v60  ;;  %1177 = vmatpush3.msra.mxu0 %v929_v61 }
 0x4bc   :  { %1143 = vmatprep.subr.mxu1 %v912_v62  ;;  %1178 = vmatprep.subr.mxu0 %v944_v63 }
 0x4bd   :  { %1144 = vmatpush3.msra.mxu1 %v896_v1  ;;  %1179 = vmatpush3.msra.mxu0 %v928_v2 }
 0x4be   :  { %1145 = vmatprep.subr.mxu1 %v911_v3  ;;  %1180 = vmatprep.subr.mxu0 %v943_v4 }
 0x4bf   :  { %1146 = vmatpush3.msra.mxu1 %v895_v5  ;;  %1181 = vmatpush3.msra.mxu0 %v927_v6 }
 0x4c0   :  { %1147 = vmatprep.subr.mxu1 %v910_v7  ;;  %1182 = vmatprep.subr.mxu0 %v942_v8 }
 0x4c1   :  { %1148 = vmatpush3.msra.mxu1 %v894_v9  ;;  %1183 = vmatpush3.msra.mxu0 %v926_v10 }
 0x4c2   :  { %1149 = vmatprep.subr.mxu1 %v909_v11  ;;  %1184 = vmatprep.subr.mxu0 %v941_v12 }
 0x4c3   :  { %1150 = vmatpush3.msra.mxu1 %v893_v13  ;;  %1185 = vmatpush3.msra.mxu0 %v925_v14 }
 0x4c4   :  { %1151 = vmatprep.subr.mxu1 %v908_v15  ;;  %1186 = vmatprep.subr.mxu0 %v940_v16 }
 0x4c5   :  { %1152 = vmatpush3.msra.mxu1 %v892_v17  ;;  %1187 = vmatpush3.msra.mxu0 %v924_v18 }
 0x4c6   :  { %1153 = vmatprep.subr.mxu1 %v907_v19  ;;  %1188 = vmatprep.subr.mxu0 %v939_v20 }
 0x4c7   :  { %1154 = vmatpush3.msra.mxu1 %v891_v21  ;;  %1189 = vmatpush3.msra.mxu0 %v923_v22 }
 0x4c8   :  { %1155 = vmatprep.subr.mxu1 %v906_v0  ;;  %1190 = vmatprep.subr.mxu0 %v938_v23 }
 0x4c9   :  { %1156 = vmatpush3.msra.mxu1 %v890_v24  ;;  %1191 = vmatpush3.msra.mxu0 %v922_v25 }
 0x4ca   :  { %1157 = vmatprep.subr.mxu1 %v905_v26  ;;  %1192 = vmatprep.subr.mxu0 %v937_v27 }
 0x4cb   :  { %1158 = vmatpush3.msra.mxu1 %v889_v28  ;;  %1193 = vmatpush3.msra.mxu0 %v921_v29 }
 0x4cc   :  { %1159 = vmatprep.subr.mxu1 %v904_v30  ;;  %1194 = vmatprep.subr.mxu0 %v936_v31 }
 0x4cd   :  { %1160 = vmatpush3.msra.mxu1 %v888_v32  ;;  %1195 = vmatpush3.msra.mxu0 %v920_v33 }
 0x4ce   :  { %1161 = vmatprep.subr.mxu1 %v903_v34  ;;  %1196 = vmatprep.subr.mxu0 %v935_v35 }
 0x4cf   :  { %1162 = vmatpush3.msra.mxu1 %v887_v36  ;;  %1197 = vmatpush3.msra.mxu0 %v919_v37 }
 0x4d0   :  { %1163 = vmatprep.subr.mxu1 %v902_v38  ;;  %1198 = vmatprep.subr.mxu0 %v934_v39 }
 0x4d1   :  { %1164 = vmatpush3.msra.mxu1 %v886_v40  ;;  %1199 = vmatpush3.msra.mxu0 %v918_v41  ;;  %v1124_v40 = vld [vmem:[%s1619_s10] ss:$0 sm:$0xff] }
 0x4d2   :  { %1165 = vmatprep.subr.mxu1 %v901_v42  ;;  %1200 = vmatprep.subr.mxu0 %v933_v43 }
 0x4d3   :  { %1166 = vmatpush3.msra.mxu1 %v885_v45  ;;  %1201 = vmatpush3.msra.mxu0 %v917_v46 }
 0x574   :  { %v773_v58 = vpop.f32.mrf.mxu1  ;;  %v844_v59 = vpop.f32.mrf.mxu0 }
 0x575   :  { %v774_v60 = vadd.f32 %v773_v58, %v690_v54  ;;  %v845_v61 = vadd.f32 %v844_v59, %v698_v55 }
 0x576   :  { %v775_v62 = vpop.f32.mrf.mxu1  ;;  %v846_v63 = vpop.f32.mrf.mxu0 }
 0x577   :  { %v853_v1 = vmul.f32 0.044715, %v774_v60  ;;  %v855_v2 = vmul.f32 0.044715, %v845_v61  ;;  %v776_v3 = vadd.f32 %v775_v62, %v694_v56  ;;  %v847_v4 = vadd.f32 %v846_v63, %v702_v57 }
 0x578   :  { %v849_v32 = vmul.f32 0.5, %v774_v60  ;;  %v851_v34 = vmul.f32 0.5, %v845_v61 }
 0x579   :  { %v857_v5 = vmul.f32 %v853_v1, %v774_v60  ;;  %v859_v6 = vmul.f32 %v855_v2, %v845_v61  ;;  %v854_v7 = vmul.f32 0.044715, %v776_v3  ;;  %v856_v8 = vmul.f32 0.044715, %v847_v4 }
 0x57a   :  { %v850_v27 = vmul.f32 0.5, %v776_v3  ;;  %v852_v30 = vmul.f32 0.5, %v847_v4 }
 0x57b   :  { %v861_v9 = vmul.f32 %v857_v5, %v774_v60  ;;  %v863_v10 = vmul.f32 %v859_v6, %v845_v61  ;;  %v858_v11 = vmul.f32 %v854_v7, %v776_v3  ;;  %v860_v12 = vmul.f32 %v856_v8, %v847_v4 }
 0x57d   :  { %v865_v13 = vadd.f32 %v861_v9, %v774_v60  ;;  %v867_v14 = vadd.f32 %v863_v10, %v845_v61  ;;  %v862_v15 = vmul.f32 %v858_v11, %v776_v3  ;;  %v864_v16 = vmul.f32 %v860_v12, %v847_v4 }
 0x57f   :  { %v866_v17 = vadd.f32 %v862_v15, %v776_v3  ;;  %v868_v18 = vadd.f32 %v864_v16, %v847_v4  ;;  %v869_v19 = vmul.f32 0.7978846, %v865_v13  ;;  %v871_v20 = vmul.f32 0.7978846, %v867_v14 }
 0x581   :  { %v870_v21 = vmul.f32 0.7978846, %v866_v17  ;;  %v872_v22 = vmul.f32 0.7978846, %v868_v18  ;;  %1249 = vtanh.f32 %v869_v19 }
 0x582   :  { %1251 = vtanh.f32 %v871_v20 }
 0x583   :  { %1253 = vtanh.f32 %v870_v21 }
 0x584   :  { %1255 = vtanh.f32 %v872_v22 }
 0x58e   :  { %v1250_v0 = vpop.eup %1249 }
 0x58f   :  { %v1252_v23 = vpop.eup %1251  ;;  %v877_v25 = vadd.f32 1.0, %v1250_v0 }
 0x590   :  { %v1254_v24 = vpop.eup %1253  ;;  %v879_v29 = vadd.f32 1.0, %v1252_v23 }
 0x591   :  { %v1256_v26 = vpop.eup %1255  ;;  %v878_v28 = vadd.f32 1.0, %v1254_v24  ;;  %v881_v36 = vmul.f32 %v877_v25, %v849_v32 }
 0x592   :  { %v880_v31 = vadd.f32 1.0, %v1256_v26  ;;  %v883_v37 = vmul.f32 %v879_v29, %v851_v34 }
 0x593   :  { %v882_v33 = vmul.f32 %v878_v28, %v850_v27 }
 0x594   :  { %v884_v35 = vmul.f32 %v880_v31, %v852_v30 }
 0x595   :  { %1020 = vmatprep.mubr.f32.mxu1 %v882_v33 }
 0x596   :  { %1090 = vmatprep.mubr.f32.mxu0 %v884_v35  ;;  %1021 = vmatmul.mubr.f32.vlgmr.msra.gmra.mxu1 %v881_v36 }
 0x597   :  { %1091 = vmatmul.mubr.f32.vlgmr.msra.gmra.mxu0 %v883_v37 }
 0x656   :  { %v1167_v38 = vpop.f32.mrf.mxu1 }
 0x657   :  { %v1202_v39 = vpop.f32.mrf.mxu0 }
 0x658   :  { %v1168_v41 = vpop.f32.mrf.mxu1 }
 0x659   :  { %v1169_v42 = vadd.f32 %v1168_v41, %v1167_v38  ;;  %v1203_v43 = vpop.f32.mrf.mxu0 }
 0x65a   :  { %v1204_v46 = vadd.f32 %v1203_v43, %v1202_v39 }
 0x65b   :  { %v1023_v45 = vadd.f32 %v1169_v42, %v1124_v40 }
 0x65d   :  { %v1093_v47 = vadd.f32 %v1204_v46, %v1023_v45 }
 0x65f   :  { %v1096_v48 = vmul.f32 0.3, %v1093_v47 }
 0x661   :  { %v1097_v49 = vadd.f32 %v1096_v48, %v1595_v44 }
 0x663   :  { %1098 = vst [vmem:[#allocation16] sm:$0xff] %v1097_v49 }
 0x664   :  { %1428 = shalt.err (!%p1425_p2)
}
 0x665   :  { %1108 = dma.vmem_to_hbm [thread:$0]  %s1106_s20, 128, %s1620_s11, [#allocation4]  }
 0x666   :  { %1447 = dma.done.wait [#allocation4], 128  }
 0x667   :  { %1448 = vsyncadd [#allocation4], 4294967168 }
 0x668   :  { %1112 = vsyncpa [#allocation3], 1 }
 0x669   :  { %1113 = vsyncpa [#allocation6], 1 }
 0x66a   :  { %1114 = vsyncpa [#allocation9], 1 }
 0x66b   :  { %1115 = vsyncpa [#allocation12], 1 }
 0x66c   :  { %1116 = vsyncpa [#allocation15], 1 }
 0x66d   :  { %1117 = vsyncpa [#allocation4], 1 }

</bundles_post_ra>
